<compile_context>
chip_gen: v5e
topology: v5e:2x2
jax: 0.10.0
libtpu: 0.0.40
codegen_flags: <defaults>
</compile_context>

<pallas_src>
import functools

import jax
import jax.numpy as jnp
from jax import lax
from jax.experimental import pallas as pl
from jax.experimental.pallas import tpu as pltpu


def _round_up(v, m):
    return (v + m - 1) // m * m


def _apply_power(s, power):
    """s ** power for s in (0, 1], with static `power` special-casing."""
    if power == 1.0:
        return s
    n2 = 2.0 * power
    if n2 == int(n2) and 1.0 <= n2 <= 16.0:
        # Integer / half-integer exponents: at most one sqrt + a VALU multiply
        # chain instead of two EUP pushes (log + exp) per element.
        n2 = int(n2)
        if n2 % 2 == 0:
            base, reps = s, n2 // 2
        else:
            base, reps = jnp.sqrt(s), n2
        out = base
        for _ in range(reps - 1):
            out = out * base
        return out
    # Generic fallback: s in (0, 1] so log is safe (EUP ops).
    return jnp.exp(power * jnp.log(s))


def clustering_kernel(x_ref, w_ref, wsq_ref, o_ref, *, inv_alpha, power):
    # x_ref:   (bb, F)  batch row-block, caller dtype (upcast here, not in HBM)
    # w_ref:   (K, F)   cluster centers, VMEM-resident across the grid
    # wsq_ref: (1, K)   precomputed ||mu_j||^2 (f32)
    # o_ref:   (bb, K)  soft assignments (f32)
    x = x_ref[...].astype(jnp.float32)
    w = w_ref[...].astype(jnp.float32)

    # x . W^T via one MXU matmul (batch folded into the M dimension).
    xw = lax.dot_general(
        x, w, dimension_numbers=(((1,), (1,)), ((), ())),
        preferred_element_type=jnp.float32)                      # (bb, K)

    # ||x_i||^2 : lane-axis reduce on the XLU (free slot next to the MXU).
    xsq = jnp.sum(x * x, axis=1, keepdims=True)                  # (bb, 1)

    # Squared distances; the expanded form can go slightly negative -> clamp.
    # (Catastrophic cancellation only matters for x_i ~= mu_j with huge-norm
    # features; acceptable for DEC-style normalized embeddings.)
    d = jnp.maximum(xsq - 2.0 * xw + wsq_ref[...], 0.0)          # (bb, K)

    # Student's t kernel.  Inner reciprocal kept exact so the result matches
    # the torch reference at 1e-5.
    s = 1.0 / (1.0 + d * inv_alpha)
    s = _apply_power(s, power)

    # Row normalization: approx reciprocal of the (bb,1) denominator + two
    # Newton steps (full f32 accuracy, rows still sum to 1 at 1e-5), then a
    # broadcast multiply -- avoids bb*K exact divides on the single EUP slot.
    denom = jnp.sum(s, axis=1, keepdims=True)                    # (bb, 1)
    inv = pl.reciprocal(denom, approx=True)
    inv = inv * (2.0 - denom * inv)
    inv = inv * (2.0 - denom * inv)
    o_ref[...] = (s * inv).astype(o_ref.dtype)


def _pick_block_b(b, f, k, in_itemsize, *, target_hbm_bytes=1 << 20,
                  vmem_budget=12 << 20, min_steps=4):
    """Batch row-block sized from a byte budget instead of a fixed row count."""
    # Keep the second-minor block dim a multiple of the sublane tile of the
    # input dtype (f32: 8, bf16: 16, int8/fp8: 32).
    align = max(8, 32 // in_itemsize)
    if b <= align:
        return b                                   # single full-extent block
    # ~1 MiB of x HBM traffic per grid step hides DMA latency / step overhead.
    bb = max(align,
             (target_hbm_bytes // max(1, f * in_itemsize)) // align * align)
    # Cap by VMEM: narrow blocks are lane-padded to 128 and double-buffered.
    per_row = 2 * _round_up(f, 128) * in_itemsize + 2 * _round_up(k, 128) * 4
    bb = min(bb, max(align, (vmem_budget // per_row) // align * align))
    # Keep the grid >= min_steps deep when possible (pipeline overlap; v7x's
    # two TensorCores are only fed by sharding this "parallel" axis).
    if b >= align * min_steps:
        bb = min(bb, max(align, (pl.cdiv(b, min_steps) // align) * align))
    return int(min(bb, (b // align) * align))


def clustering_layer(x, weight, alpha=1.0, *, block_b=None):
    """Pallas forward of ClusteringLayer.  x: (B, F), weight: (K, F) -> (B, K) f32."""
    b, f = x.shape
    k, f2 = weight.shape
    assert f == f2, "feature dims of x and weight must match"

    # Parameter-only precompute (matches the in-kernel f32 upcast of weight).
    w32 = weight.astype(jnp.float32)
    wsq = jnp.sum(w32 * w32, axis=1)[None, :]                    # (1, K) f32

    x_itemsize = jnp.dtype(x.dtype).itemsize
    w_itemsize = jnp.dtype(weight.dtype).itemsize
    bb = (_pick_block_b(b, f, k, x_itemsize) if block_b is None
          else min(int(block_b), b))
    grid = (pl.cdiv(b, bb),)

    power = (float(alpha) + 1.0) / 2.0
    kern = functools.partial(clustering_kernel,
                             inv_alpha=1.0 / float(alpha), power=power)

    # VMEM budget, lane-padding aware (narrow F/K blocks pad to 128 lanes).
    pad_f, pad_k = _round_up(f, 128), _round_up(k, 128)
    vmem_bytes = (2 * bb * pad_f * x_itemsize                    # x (double-buffered)
                  + 2 * bb * pad_k * 4                           # out (double-buffered)
                  + 2 * _round_up(k, 8) * pad_f * w_itemsize     # resident weight
                  + 2 * 8 * pad_k * 4                            # resident ||w||^2
                  + (4 << 20))                                   # compiler headroom
    # NOTE: the grid-invariant weight/wsq inputs could be single-buffered
    # (pipeline_mode=pl.Buffered(1)) to reclaim VMEM on v7x; at this K*F the
    # saving is <1 KiB, so they are left at the default double buffering.
    # NOTE: for very large K*F (weights no longer VMEM-resident) this kernel
    # would need a K-tile grid axis with a running-denominator scratch.

    n2 = 2.0 * power
    if power == 1.0:
        trans_per_elem = 0
    elif n2 == int(n2) and 1.0 <= n2 <= 16.0:
        trans_per_elem = int(n2) % 2           # sqrt only on half-integer path
    else:
        trans_per_elem = 2                     # log + exp fallback
    cost = pl.CostEstimate(
        flops=2 * b * f * k + 10 * b * k,
        transcendentals=b * k * (trans_per_elem + 1) + b,
        bytes_accessed=b * f * x_itemsize + k * f * w_itemsize + 4 * k + 4 * b * k)

    return pl.pallas_call(
        kern,
        out_shape=jax.ShapeDtypeStruct((b, k), jnp.float32),
        grid=grid,
        in_specs=[
            pl.BlockSpec((bb, f), lambda i: (i, 0)),   # x row-block (caller dtype)
            pl.BlockSpec((k, f), lambda i: (0, 0)),    # weight, VMEM-resident
            pl.BlockSpec((1, k), lambda i: (0, 0)),    # ||w||^2, VMEM-resident
        ],
        out_specs=pl.BlockSpec((bb, k), lambda i: (i, 0)),
        compiler_params=pltpu.CompilerParams(
            dimension_semantics=("parallel",),
            vmem_limit_bytes=int(vmem_bytes)),
        cost_estimate=cost,
    )(x, weight, wsq)


# Pure-JAX reference (direct transcription of the PyTorch forward).
def clustering_ref(x, weight, alpha):
    x = x.astype(jnp.float32)
    weight = weight.astype(jnp.float32)
    d = jnp.sum((x[:, None, :] - weight[None, :, :]) ** 2, axis=2)
    s = 1.0 / (1.0 + d / alpha)
    s = s ** ((alpha + 1.0) / 2.0)
    return s / jnp.sum(s, axis=1, keepdims=True)


if __name__ == "__main__":
    NUM_FEATURES, NUM_CLUSTERS = 16, 10
    key = jax.random.PRNGKey(0)
    kx, kw = jax.random.split(key)

    # xavier_uniform_ init for weight (num_clusters, num_features).
    bound = (6.0 / (NUM_FEATURES + NUM_CLUSTERS)) ** 0.5
    weight = jax.random.uniform(
        kw, (NUM_CLUSTERS, NUM_FEATURES), jnp.float32, -bound, bound)

    # Exercise: power == 1 fast path, half-integer (sqrt chain), integer
    # (multiply chain), generic exp/log fallback; multi-step grid (B=32 ->
    # four blocks of 8) and a ragged last block (B=100, bb=24).
    cases = [(32, 1.0), (32, 2.0), (100, 3.0), (32, 0.6)]
    for idx, (B, alpha) in enumerate(cases):
        x = jax.random.normal(jax.random.fold_in(kx, idx), (B, NUM_FEATURES),
                              dtype=jnp.float32)
        q = jax.block_until_ready(clustering_layer(x, weight, alpha=alpha))
        ref = clustering_ref(x, weight, alpha)
        assert q.shape == (B, NUM_CLUSTERS)
        assert bool(jnp.all(jnp.isfinite(q)))
        assert bool(jnp.allclose(jnp.sum(q, axis=1), 1.0, atol=1e-5))
        assert bool(jnp.allclose(q, ref, rtol=1e-4, atol=1e-5)), (
            alpha, float(jnp.max(jnp.abs(q - ref))))

    # bf16 input path: HBM traffic stays in the caller's dtype (upcast happens
    # inside the kernel); output stays f32 so rows still sum to 1 at 1e-5.
    xb = jax.random.normal(jax.random.fold_in(kx, 99), (64, NUM_FEATURES),
                           dtype=jnp.float32).astype(jnp.bfloat16)
    qb = jax.block_until_ready(clustering_layer(xb, weight, alpha=1.0))
    refb = clustering_ref(xb, weight, alpha=1.0)
    assert qb.dtype == jnp.float32 and qb.shape == (64, NUM_CLUSTERS)
    assert bool(jnp.all(jnp.isfinite(qb)))
    assert bool(jnp.allclose(jnp.sum(qb, axis=1), 1.0, atol=1e-5))
    assert bool(jnp.allclose(qb, refb, rtol=1e-4, atol=1e-5))

    print("KERNEL_OK")
</pallas_src>

<mosaic_0001>
module attributes {stable_mosaic.version = 11 : i64} {
  func.func @clustering_kernel(%arg0: i32, %arg1: memref<8x16xf32, #tpu.memory_space<vmem>>, %arg2: memref<10x16xf32, #tpu.memory_space<vmem>>, %arg3: memref<1x10xf32, #tpu.memory_space<vmem>>, %arg4: memref<8x10xf32, #tpu.memory_space<vmem>>) attributes {dimension_semantics = [#tpu.dimension_semantics<parallel>], iteration_bounds = array<i64: 4>, scalar_prefetch = 0 : i64, scratch_operands = 0 : i64, tpu.core_type = #tpu.core_type<tc>, window_params = [{transform_indices = @transform_0, window_bounds = array<i64: 8, 16>}, {pipeline_mode = #tpu.pipeline_mode<synchronous>, transform_indices = @transform_1, window_bounds = array<i64: 10, 16>}, {pipeline_mode = #tpu.pipeline_mode<synchronous>, transform_indices = @transform_2, window_bounds = array<i64: 1, 10>}, {transform_indices = @transform_3, window_bounds = array<i64: 8, 10>}]} {
    %c0 = arith.constant 0 : index
    %c0_0 = arith.constant 0 : index
    %0 = vector.load %arg1[%c0, %c0_0] : memref<8x16xf32, #tpu.memory_space<vmem>>, vector<8x16xf32>
    %c0_1 = arith.constant 0 : index
    %c0_2 = arith.constant 0 : index
    %1 = vector.load %arg2[%c0_1, %c0_2] : memref<10x16xf32, #tpu.memory_space<vmem>>, vector<10x16xf32>
    %cst = arith.constant dense<0.000000e+00> : vector<8x10xf32>
    %2 = tpu.matmul %0, %1, %cst {dimension_numbers = #tpu.dot_dimension_numbers<[1], [1], [0], [0], [0, 0, 1, 0], [], []>} : vector<8x16xf32>, vector<10x16xf32>, vector<8x10xf32> -> vector<8x10xf32>
    %3 = arith.mulf %0, %0 : vector<8x16xf32>
    %cst_3 = arith.constant dense<0.000000e+00> : vector<8xf32>
    %4 = vector.multi_reduction <add>, %3, %cst_3 [1] : vector<8x16xf32> to vector<8xf32>
    %5 = vector.shape_cast %4 : vector<8xf32> to vector<8x1xf32>
    %cst_4 = arith.constant 2.000000e+00 : f32
    %6 = vector.broadcast %cst_4 : f32 to vector<8x10xf32>
    %7 = arith.mulf %6, %2 : vector<8x10xf32>
    %8 = vector.broadcast %5 : vector<8x1xf32> to vector<8x10xf32>
    %9 = arith.subf %8, %7 : vector<8x10xf32>
    %c0_5 = arith.constant 0 : index
    %c0_6 = arith.constant 0 : index
    %10 = vector.load %arg3[%c0_5, %c0_6] : memref<1x10xf32, #tpu.memory_space<vmem>>, vector<1x10xf32>
    %11 = vector.broadcast %10 : vector<1x10xf32> to vector<8x10xf32>
    %12 = arith.addf %9, %11 : vector<8x10xf32>
    %cst_7 = arith.constant 0.000000e+00 : f32
    %13 = vector.broadcast %cst_7 : f32 to vector<8x10xf32>
    %14 = arith.maximumf %12, %13 : vector<8x10xf32>
    %cst_8 = arith.constant 1.000000e+00 : f32
    %15 = vector.broadcast %cst_8 : f32 to vector<8x10xf32>
    %16 = arith.mulf %14, %15 : vector<8x10xf32>
    %cst_9 = arith.constant 1.000000e+00 : f32
    %17 = vector.broadcast %cst_9 : f32 to vector<8x10xf32>
    %18 = arith.addf %17, %16 : vector<8x10xf32>
    %cst_10 = arith.constant 1.000000e+00 : f32
    %19 = vector.broadcast %cst_10 : f32 to vector<8x10xf32>
    %20 = arith.divf %19, %18 : vector<8x10xf32>
    %cst_11 = arith.constant dense<0.000000e+00> : vector<8xf32>
    %21 = vector.multi_reduction <add>, %20, %cst_11 [1] : vector<8x10xf32> to vector<8xf32>
    %22 = vector.shape_cast %21 : vector<8xf32> to vector<8x1xf32>
    %23 = tpu.reciprocal %22 {approx = true} : vector<8x1xf32> -> vector<8x1xf32>
    %24 = arith.mulf %22, %23 : vector<8x1xf32>
    %cst_12 = arith.constant 2.000000e+00 : f32
    %25 = vector.broadcast %cst_12 : f32 to vector<8x1xf32>
    %26 = arith.subf %25, %24 : vector<8x1xf32>
    %27 = arith.mulf %23, %26 : vector<8x1xf32>
    %28 = arith.mulf %22, %27 : vector<8x1xf32>
    %cst_13 = arith.constant 2.000000e+00 : f32
    %29 = vector.broadcast %cst_13 : f32 to vector<8x1xf32>
    %30 = arith.subf %29, %28 : vector<8x1xf32>
    %31 = arith.mulf %27, %30 : vector<8x1xf32>
    %32 = vector.broadcast %31 : vector<8x1xf32> to vector<8x10xf32>
    %33 = arith.mulf %20, %32 : vector<8x10xf32>
    %c0_14 = arith.constant 0 : index
    %c0_15 = arith.constant 0 : index
    %34 = vector.load %arg4[%c0_14, %c0_15] : memref<8x10xf32, #tpu.memory_space<vmem>>, vector<8x10xf32>
    tpu.vector_store %arg4[%c0_14, %c0_15], %33 {strides = array<i32>} : memref<8x10xf32, #tpu.memory_space<vmem>>, vector<8x10xf32>,
    return
  }
  func.func @transform_0(%arg0: i32) -> (i32, i32) {
    %c0_i32 = arith.constant 0 : i32
    %c0_i32_0 = arith.constant 0 : i32
    return %arg0, %c0_i32 : i32, i32
  }
  func.func @transform_1(%arg0: i32) -> (i32, i32) {
    %c0_i32 = arith.constant 0 : i32
    %c0_i32_0 = arith.constant 0 : i32
    %c0_i32_1 = arith.constant 0 : i32
    return %c0_i32, %c0_i32_0 : i32, i32
  }
  func.func @transform_2(%arg0: i32) -> (i32, i32) {
    %c0_i32 = arith.constant 0 : i32
    %c0_i32_0 = arith.constant 0 : i32
    %c0_i32_1 = arith.constant 0 : i32
    return %c0_i32, %c0_i32_0 : i32, i32
  }
  func.func @transform_3(%arg0: i32) -> (i32, i32) {
    %c0_i32 = arith.constant 0 : i32
    %c0_i32_0 = arith.constant 0 : i32
    return %arg0, %c0_i32 : i32, i32
  }
}

</mosaic_0001>

<bundles_post_ra>
// kernel: tpu_custom_call.1
= control target key start
LH: loop header
LB: loop body
LE: loop exit
PB: predicated region body
PF: predicated region fallthrough
CT: control target
= control target key end

     0   :  { %s346_s12 = smov 0   ;;  %s381_s0 = inlined_call_operand.vmem [shape: f32[32,16], index: 0, kind: input, shape index: {}]   ;;  %s382_s1 = inlined_call_operand.vmem [shape: f32[10,16], index: 1, kind: input, shape index: {}]   ;;  %s383_s2 = inlined_call_operand.vmem [shape: f32[1,10], index: 2, kind: input, shape index: {}]   ;;  %s384_s3 = inlined_call_operand.vmem [shape: f32[32,10], index: 3, kind: output, shape index: {}]  }
   0x1 LB: > { %s293_s13 = sadd.s32 4294967295, %s324_s12   ;;  %p297_p0 = scmp.ge.s32.totalorder %s324_s12, 1  ;;  %s324_s12 = sphi %s346_s12, %s13_s12  }
   0x2   : > { %p136_p1 = scmp.lt.s32.totalorder %s324_s12, 5 }
   0x4   : > { %p137_p2 = pnand %p297_p0, %p136_p1 }
   0x5   : > { %p158_p3 = scmp.lt.s32.totalorder (!%p137_p2), %s293_s13, 3 }
   0x6   : > { %140 = sbr.rel (%p137_p2) target bundleno = 311 (0x137), region = 32 }
   0xb   : > { %v168_v0 = vld [vmem:[%s382_s1 + $0x8] sm:$0x3]  ;;  %vm169_vm0 = vcmask 130048   ;;  %v167_v1 = vld [vmem:[%s382_s1] sm:$0xff]  ;;  %s386_s13 = smov (!%p158_p3, %s293_s13), 3  ;;  %vm227_vm4 = vcmask 80896  }
   0xc   : > { %300 = vmatpush.xpose.msk.msra.mxu0 %vm169_vm0, %v168_v0  ;;  %s298_s18 = sshll.u32 %s386_s13, 3  ;;  %v313_v8 = vld [vmem:[%s383_s2] ss:$0 sm:$0xff] }
   0xd   : > { %s161_s21 = scalar_lea.vmem %s381_s0, %s298_s18  ;;  %s165_s26 = scalar_lea.vmem %s384_s3, %s298_s18 }
   0xe   : > { %v166_v2 = vld [vmem:[%s161_s21] sm:$0xff] }
   0xf   : > { %v199_v3 = vmul.f32 %v166_v2, %v166_v2 }
  0x10   : > { %301 = vmatpush.xpose.msk.msra.mxu0 %vm169_vm0, %v167_v1 }
  0x11   : > { %v200_v4 = vsel %vm169_vm0, %v199_v3, 0.0 }
  0x12   : > { %201 = vadd.xlane.f32.xlu0 %v200_v4 }
  0x13   : > { %302 = vmatmul.msk.f32.vlgmr.msra.gmra.mxu0 %vm169_vm0, %v166_v2 }
  0x85   : > { %v202_v6 = vpop.xlane.xlu0 %201 }
  0x90   : > { %v196_v5 = vpop.f32.mrf.mxu0 }
  0x91   : > { %v203_v7 = vmul.f32 2.0, %v196_v5 }
  0x93   : > { %v204_v9 = vsub.f32 %v202_v6, %v203_v7 }
  0x95   : > { %v209_v10 = vadd.f32 %v313_v8, %v204_v9 }
  0x97   : > { %v210_v11 = vmax.f32 %v209_v10, 0.0 }
  0x99   : > { %v211_v12 = vadd.f32 1.0, %v210_v11 }
  0x9b   : > { %314 = vrcp.f32 %v211_v12  ;;  %v223_v16 = vand.u32 2147483648, %v211_v12  ;;  %v221_v18 = vand.u32 2147483647, %v211_v12  ;;  %vm217_vm2 = vweird.f32 %v211_v12 }
  0x9d   : > { %v224_v20 = vor.u32 1.1754944e-38, %v223_v16  ;;  %vm222_vm5 = vcmp.eq.f32.partialorder %v221_v18, 8.507059e+37 }
  0xa1   : > { %v315_v13 = vpop.eup %314 }
  0xa2   : > { %v213_v14 = vmul.f32 %v315_v13, %v211_v12  ;;  %vm218_vm1 = vweird.f32 %v315_v13 }
  0xa3   : > { %vm219_vm3 = vmor %vm217_vm2, %vm218_vm1 }
  0xa4   : > { %v214_v15 = vsub.f32 1.0, %v213_v14 }
  0xa6   : > { %v215_v17 = vmul.f32 %v315_v13, %v214_v15 }
  0xa8   : > { %v216_v19 = vadd.f32 %v315_v13, %v215_v17 }
  0xaa   : > { %v220_v21 = vsel %vm219_vm3, %v315_v13, %v216_v19 }
  0xab   : > { %v225_v22 = vsel %vm222_vm5, %v224_v20, %v220_v21 }
  0xac   : > { %v228_v23 = vsel %vm227_vm4, %v225_v22, 0.0 }
  0xad   : > { %229 = vadd.xlane.f32.xlu0 %v228_v23 }
 0x120   : > { %v230_v24 = vpop.xlane.xlu0 %229 }
 0x121   : > { %316 = vrcp.f32 %v230_v24 }
 0x127   : > { %v317_v25 = vpop.eup %316 }
 0x128   : > { %v232_v26 = vmul.f32 %v317_v25, %v230_v24 }
 0x12a   : > { %v233_v27 = vsub.f32 2.0, %v232_v26 }
 0x12c   : > { %v234_v28 = vmul.f32 %v317_v25, %v233_v27 }
 0x12e   : > { %v235_v29 = vmul.f32 %v234_v28, %v230_v24 }
 0x130   : > { %v236_v30 = vsub.f32 2.0, %v235_v29 }
 0x132   : > { %v237_v31 = vmul.f32 %v236_v30, %v234_v28 }
 0x134   : > { %v238_v32 = vmul.f32 %v237_v31, %v225_v22 }
 0x136   : > { %239 = vst.msk [vmem:[%s165_s26] sm:$0xff] %vm227_vm4, %v238_v32 }
 0x137 PF: > { %s13_s12 = sadd.s32 1, %s324_s12  }
 0x138   : > { %p10_p4 = scmp.ge.s32.totalorder %s13_s12, 6  }
 0x13a   :  { %12 = sbr.rel (!%p10_p4) target bundleno = 1 (0x1), region = 62 }

</bundles_post_ra>
